<compile_context>
chip_gen: v6e
topology: v6e:2x2x1
jax: 0.10.0
libtpu: 0.0.40
codegen_flags: <defaults>
</compile_context>

<pallas_src>
import math

import jax
import jax.numpy as jnp
from jax.experimental import pallas as pl
from jax.experimental.pallas import tpu as pltpu

# ---------------- model hyper-params (small, synthetic) ----------------
VOCAB = 100
MAX_POS = 16
HIDDEN = 32
FFN = 64
NUM_LAYERS = 4          # hidden_states = [emb, l1..l4]; last 4 = layer outputs
BATCH = 2
SEQ = 8

NEG_INF = -1e9


# ---------------- shared math helpers (pure jnp; used in & out of kernel) ----
def _layer_norm(x, g, b, eps=1e-12):
    mu = jnp.mean(x, axis=-1, keepdims=True)
    var = jnp.mean(jnp.square(x - mu), axis=-1, keepdims=True)
    return (x - mu) * jax.lax.rsqrt(var + eps) * g + b


def _gelu(x):
    c = math.sqrt(2.0 / math.pi)
    return 0.5 * x * (1.0 + jnp.tanh(c * (x + 0.044715 * x * x * x)))


# ---------------- fused Pallas kernel: 4 encoder layers + last-4 sum --------
def fused_encoder_kernel(x_ref, bias_ref, wqkvo_ref, w1_ref, w2_ref,
                         vec_ref, b1_ref, o_ref, h_scr):
    """Grid axis = layer index (sequential). Hidden state lives in VMEM scratch
    across layers; the sum of the last 4 layer outputs accumulates directly in
    the resident output block."""
    l = pl.program_id(0)
    n_layers = pl.num_programs(0)

    @pl.when(l == 0)
    def _init():
        h_scr[...] = x_ref[...]                   # embedding output (B*S, H)
        o_ref[...] = jnp.zeros_like(o_ref)

    h = h_scr[...]                                # (B*S, H) f32, VMEM-resident
    h_bf = h.astype(jnp.bfloat16)
    H = h.shape[-1]

    # ---- single-head self-attention: all 2-D matmuls, bf16 MXU / f32 acc ----
    q = jnp.dot(h_bf, wqkvo_ref[0, 0], preferred_element_type=jnp.float32) + vec_ref[0, 0]
    k = jnp.dot(h_bf, wqkvo_ref[0, 1], preferred_element_type=jnp.float32) + vec_ref[0, 1]
    v = jnp.dot(h_bf, wqkvo_ref[0, 2], preferred_element_type=jnp.float32) + vec_ref[0, 2]

    s = jnp.einsum('qh,kh->qk', q.astype(jnp.bfloat16), k.astype(jnp.bfloat16),
                   preferred_element_type=jnp.float32) * (1.0 / math.sqrt(H))
    s = s + bias_ref[...]                         # block-diag batch mask + key padding
    s = s - jnp.max(s, axis=-1, keepdims=True)
    p = jnp.exp(s)                                # f32 elementwise (v5e-safe)
    p = p * pl.reciprocal(jnp.sum(p, axis=-1, keepdims=True), approx=True)

    ctx = jnp.dot(p.astype(jnp.bfloat16), v.astype(jnp.bfloat16),
                  preferred_element_type=jnp.float32)
    attn = jnp.dot(ctx.astype(jnp.bfloat16), wqkvo_ref[0, 3],
                   preferred_element_type=jnp.float32) + vec_ref[0, 3]

    h1 = _layer_norm(h + attn, vec_ref[0, 4], vec_ref[0, 5])

    # ---- feed-forward ----
    ff = jnp.dot(h1.astype(jnp.bfloat16), w1_ref[0],
                 preferred_element_type=jnp.float32) + b1_ref[0]
    ff = _gelu(ff)
    ff = jnp.dot(ff.astype(jnp.bfloat16), w2_ref[0],
                 preferred_element_type=jnp.float32) + vec_ref[0, 6]

    h_new = _layer_norm(h1 + ff, vec_ref[0, 7], vec_ref[0, 8])
    h_scr[...] = h_new

    @pl.when(l >= n_layers - 4)                   # sum(hidden_states[-4:])
    def _accum():
        o_ref[...] += h_new


# ---------------- wrapper ----------------
def _attention_bias_2d(attn_mask):
    """Additive (B*S, B*S) bias: -1e9 for cross-batch pairs or padded keys."""
    B, S = attn_mask.shape
    key_keep = attn_mask.astype(jnp.float32).reshape(-1)          # (B*S,)
    batch_ids = jnp.repeat(jnp.arange(B), S)                      # (B*S,)
    same_batch = batch_ids[:, None] == batch_ids[None, :]
    keep = jnp.where(same_batch, key_keep[None, :], 0.0)
    return (1.0 - keep) * NEG_INF                                 # (B*S, B*S)


def pretrained_encoder_forward(params, input_ids, attn_mask):
    B, S = input_ids.shape
    # TODO(synk): embedding-table gather (integer indexing) stays in plain JAX;
    # it is glue, not the hot path.
    emb = params['tok_emb'][input_ids] + params['pos_emb'][None, :S, :]
    h0 = _layer_norm(emb, params['emb_ln_g'], params['emb_ln_b'])  # (B,S,H)

    x2d = h0.reshape(B * S, HIDDEN)
    bias2d = _attention_bias_2d(attn_mask)

    grid_spec = pltpu.PrefetchScalarGridSpec(
        num_scalar_prefetch=0,
        grid=(NUM_LAYERS,),
        in_specs=[
            pl.BlockSpec((B * S, HIDDEN), lambda l: (0, 0)),                 # x (fetched once)
            pl.BlockSpec((B * S, B * S), lambda l: (0, 0)),                  # attention bias
            pl.BlockSpec((1, 4, HIDDEN, HIDDEN), lambda l: (l, 0, 0, 0)),    # wq|wk|wv|wo slab
            pl.BlockSpec((1, HIDDEN, FFN), lambda l: (l, 0, 0)),             # w1
            pl.BlockSpec((1, FFN, HIDDEN), lambda l: (l, 0, 0)),             # w2
            pl.BlockSpec((1, 9, 1, HIDDEN), lambda l: (l, 0, 0, 0)),         # bias/LN slab
            pl.BlockSpec((1, 1, FFN), lambda l: (l, 0, 0)),                  # b1
        ],
        out_specs=pl.BlockSpec((B * S, HIDDEN), lambda l: (0, 0)),
        scratch_shapes=[pltpu.VMEM((B * S, HIDDEN), jnp.float32)],           # resident h
    )

    out2d = pl.pallas_call(
        fused_encoder_kernel,
        out_shape=jax.ShapeDtypeStruct((B * S, HIDDEN), jnp.float32),
        grid_spec=grid_spec,
        compiler_params=pltpu.CompilerParams(
            dimension_semantics=("arbitrary",)),   # layers carry state -> sequential
    )(x2d, bias2d, params['wqkvo'], params['w1'], params['w2'],
      params['vec'], params['b1'])

    return out2d.reshape(B, S, HIDDEN)


# ---------------- parameter init (deterministic, packed layout) -------------
def init_params(key):
    def dense(k, shape, scale=0.02):
        return (scale * jax.random.normal(k, shape)).astype(jnp.float32)

    keys = jax.random.split(key, 2 + NUM_LAYERS)
    wqkvo, w1s, w2s, vecs, b1s = [], [], [], [], []
    for l in range(NUM_LAYERS):
        ks = jax.random.split(keys[2 + l], 16)
        wq = dense(ks[0], (HIDDEN, HIDDEN)); bq = dense(ks[1], (HIDDEN,))
        wk = dense(ks[2], (HIDDEN, HIDDEN)); bk = dense(ks[3], (HIDDEN,))
        wv = dense(ks[4], (HIDDEN, HIDDEN)); bv = dense(ks[5], (HIDDEN,))
        wo = dense(ks[6], (HIDDEN, HIDDEN)); bo = dense(ks[7], (HIDDEN,))
        w1 = dense(ks[8], (HIDDEN, FFN));    b1 = dense(ks[9], (FFN,))
        w2 = dense(ks[10], (FFN, HIDDEN));   b2 = dense(ks[11], (HIDDEN,))
        g1 = 1.0 + dense(ks[12], (HIDDEN,)); be1 = dense(ks[13], (HIDDEN,))
        g2 = 1.0 + dense(ks[14], (HIDDEN,)); be2 = dense(ks[15], (HIDDEN,))

        wqkvo.append(jnp.stack([wq, wk, wv, wo], axis=0))                     # (4,H,H)
        w1s.append(w1)
        w2s.append(w2)
        # bias/LN slab rows: [bq, bk, bv, bo, g1, be1, b2, g2, be2]
        vecs.append(jnp.stack([bq, bk, bv, bo, g1, be1, b2, g2, be2],
                              axis=0)[:, None, :])                            # (9,1,H)
        b1s.append(b1[None, :])                                               # (1,F)

    return {
        'tok_emb': dense(keys[0], (VOCAB, HIDDEN)),
        'pos_emb': dense(keys[1], (MAX_POS, HIDDEN)),
        'emb_ln_g': jnp.ones((1, 1, HIDDEN), jnp.float32),
        'emb_ln_b': jnp.zeros((1, 1, HIDDEN), jnp.float32),
        # bf16 MXU operands (f32 accumulation inside the kernel)
        'wqkvo': jnp.stack(wqkvo).astype(jnp.bfloat16),    # (L,4,H,H)
        'w1': jnp.stack(w1s).astype(jnp.bfloat16),         # (L,H,F)
        'w2': jnp.stack(w2s).astype(jnp.bfloat16),         # (L,F,H)
        'vec': jnp.stack(vecs),                            # (L,9,1,H) f32
        'b1': jnp.stack(b1s),                              # (L,1,F)  f32
    }


# ---------------- pure-JAX reference (PyTorch-equivalent semantics) ---------
def reference_forward(params, input_ids, attn_mask):
    B, S = input_ids.shape
    emb = params['tok_emb'][input_ids] + params['pos_emb'][None, :S, :]
    h = _layer_norm(emb, params['emb_ln_g'], params['emb_ln_b'])
    mask = (1.0 - attn_mask.astype(jnp.float32))[:, None, :] * NEG_INF        # (B,1,S)
    hidden_states = [h]
    for l in range(NUM_LAYERS):
        def w(i): return params['wqkvo'][l, i]
        def vrow(i): return params['vec'][l, i, 0]
        hb = h.astype(jnp.bfloat16)
        q = jnp.einsum('bsh,hd->bsd', hb, w(0), preferred_element_type=jnp.float32) + vrow(0)
        k = jnp.einsum('bsh,hd->bsd', hb, w(1), preferred_element_type=jnp.float32) + vrow(1)
        v = jnp.einsum('bsh,hd->bsd', hb, w(2), preferred_element_type=jnp.float32) + vrow(2)
        s = jnp.einsum('bqh,bkh->bqk', q.astype(jnp.bfloat16), k.astype(jnp.bfloat16),
                       preferred_element_type=jnp.float32) * (1.0 / math.sqrt(HIDDEN))
        s = s + mask
        s = s - jnp.max(s, axis=-1, keepdims=True)
        p = jnp.exp(s)
        p = p / jnp.sum(p, axis=-1, keepdims=True)
        ctx = jnp.einsum('bqk,bkh->bqh', p.astype(jnp.bfloat16), v.astype(jnp.bfloat16),
                         preferred_element_type=jnp.float32)
        attn = jnp.einsum('bsh,hd->bsd', ctx.astype(jnp.bfloat16), w(3),
                          preferred_element_type=jnp.float32) + vrow(3)
        h1 = _layer_norm(h + attn, vrow(4), vrow(5))
        ff = _gelu(jnp.einsum('bsh,hf->bsf', h1.astype(jnp.bfloat16), params['w1'][l],
                              preferred_element_type=jnp.float32) + params['b1'][l, 0])
        ff = jnp.einsum('bsf,fh->bsh', ff.astype(jnp.bfloat16), params['w2'][l],
                        preferred_element_type=jnp.float32) + vrow(6)
        h = _layer_norm(h1 + ff, vrow(7), vrow(8))
        hidden_states.append(h)
    return jnp.sum(jnp.stack(hidden_states[-4:], axis=0), axis=0)


if __name__ == "__main__":
    key = jax.random.PRNGKey(0)
    pkey, ikey = jax.random.split(key)
    params = init_params(pkey)

    input_ids = jax.random.randint(ikey, (BATCH, SEQ), 0, VOCAB, dtype=jnp.int32)
    attn_mask = jnp.ones((BATCH, SEQ), jnp.int32).at[1, SEQ - 2:].set(0)  # pad tail of 2nd row

    fwd = jax.jit(pretrained_encoder_forward)
    out = fwd(params, input_ids, attn_mask)
    jax.block_until_ready(out)
    assert out.shape == (BATCH, SEQ, HIDDEN) and out.dtype == jnp.float32

    ref = reference_forward(params, input_ids, attn_mask)
    max_err = float(jnp.max(jnp.abs(out - ref)))
    assert max_err < 1e-1, f"kernel/reference mismatch: max_err={max_err}"
    print("KERNEL_OK")
</pallas_src>

<mosaic_0001>
module attributes {stable_mosaic.version = 11 : i64} {
  func.func @fused_encoder_kernel(%arg0: i32, %arg1: memref<16x32xf32, #tpu.memory_space<vmem>>, %arg2: memref<16x16xf32, #tpu.memory_space<vmem>>, %arg3: memref<1x4x32x32xbf16, #tpu.memory_space<vmem>>, %arg4: memref<1x32x64xbf16, #tpu.memory_space<vmem>>, %arg5: memref<1x64x32xbf16, #tpu.memory_space<vmem>>, %arg6: memref<1x9x1x32xf32, #tpu.memory_space<vmem>>, %arg7: memref<1x1x64xf32, #tpu.memory_space<vmem>>, %arg8: memref<16x32xf32, #tpu.memory_space<vmem>>, %arg9: memref<16x32xf32, #tpu.memory_space<vmem>>) attributes {dimension_semantics = [#tpu.dimension_semantics<arbitrary>], iteration_bounds = array<i64: 4>, scalar_prefetch = 0 : i64, scratch_operands = 1 : i64, tpu.core_type = #tpu.core_type<tc>, window_params = [{pipeline_mode = #tpu.pipeline_mode<synchronous>, transform_indices = @transform_0, window_bounds = array<i64: 16, 32>}, {pipeline_mode = #tpu.pipeline_mode<synchronous>, transform_indices = @transform_1, window_bounds = array<i64: 16, 16>}, {transform_indices = @transform_2, window_bounds = array<i64: 1, 4, 32, 32>}, {transform_indices = @transform_3, window_bounds = array<i64: 1, 32, 64>}, {transform_indices = @transform_4, window_bounds = array<i64: 1, 64, 32>}, {transform_indices = @transform_5, window_bounds = array<i64: 1, 9, 1, 32>}, {transform_indices = @transform_6, window_bounds = array<i64: 1, 1, 64>}, {pipeline_mode = #tpu.pipeline_mode<synchronous>, transform_indices = @transform_7, window_bounds = array<i64: 16, 32>}]} {
    %c0_i32 = arith.constant 0 : i32
    %0 = arith.cmpi eq, %arg0, %c0_i32 : i32
    %1 = arith.extui %0 : i1 to i32
    %c0_i32_0 = arith.constant 0 : i32
    %2 = arith.cmpi ne, %1, %c0_i32_0 : i32
    scf.if %2 {
      %c0_85 = arith.constant 0 : index
      %c0_86 = arith.constant 0 : index
      %141 = vector.load %arg1[%c0_85, %c0_86] : memref<16x32xf32, #tpu.memory_space<vmem>>, vector<16x32xf32>
      %c0_87 = arith.constant 0 : index
      %c0_88 = arith.constant 0 : index
      %142 = vector.load %arg9[%c0_87, %c0_88] : memref<16x32xf32, #tpu.memory_space<vmem>>, vector<16x32xf32>
      tpu.vector_store %arg9[%c0_87, %c0_88], %141 {strides = array<i32>} : memref<16x32xf32, #tpu.memory_space<vmem>>, vector<16x32xf32>,
      %cst_89 = arith.constant 0.000000e+00 : f32
      %143 = vector.broadcast %cst_89 : f32 to vector<16x32xf32>
      %c0_90 = arith.constant 0 : index
      %c0_91 = arith.constant 0 : index
      %144 = vector.load %arg8[%c0_90, %c0_91] : memref<16x32xf32, #tpu.memory_space<vmem>>, vector<16x32xf32>
      tpu.vector_store %arg8[%c0_90, %c0_91], %143 {strides = array<i32>} : memref<16x32xf32, #tpu.memory_space<vmem>>, vector<16x32xf32>,
    } else {
    }
    %c0 = arith.constant 0 : index
    %c0_1 = arith.constant 0 : index
    %3 = vector.load %arg9[%c0, %c0_1] : memref<16x32xf32, #tpu.memory_space<vmem>>, vector<16x32xf32>
    %4 = arith.truncf %3 : vector<16x32xf32> to vector<16x32xbf16>
    %c0_2 = arith.constant 0 : index
    %c0_3 = arith.constant 0 : index
    %c0_4 = arith.constant 0 : index
    %c0_5 = arith.constant 0 : index
    %5 = vector.load %arg3[%c0_2, %c0_3, %c0_4, %c0_5] : memref<1x4x32x32xbf16, #tpu.memory_space<vmem>>, vector<1x1x32x32xbf16>
    %6 = vector.shape_cast %5 : vector<1x1x32x32xbf16> to vector<32x32xbf16>
    %cst = arith.constant dense<0.000000e+00> : vector<16x32xf32>
    %7 = tpu.matmul %4, %6, %cst {dimension_numbers = #tpu.dot_dimension_numbers<[1], [0], [0], [1], [0, 0, 1, 1], [], []>} : vector<16x32xbf16>, vector<32x32xbf16>, vector<16x32xf32> -> vector<16x32xf32>
    %c0_6 = arith.constant 0 : index
    %c0_7 = arith.constant 0 : index
    %c0_8 = arith.constant 0 : index
    %c0_9 = arith.constant 0 : index
    %8 = vector.load %arg6[%c0_6, %c0_7, %c0_8, %c0_9] : memref<1x9x1x32xf32, #tpu.memory_space<vmem>>, vector<1x1x1x32xf32>
    %9 = vector.shape_cast %8 : vector<1x1x1x32xf32> to vector<1x32xf32>
    %10 = vector.broadcast %9 : vector<1x32xf32> to vector<16x32xf32>
    %11 = arith.addf %7, %10 : vector<16x32xf32>
    %c0_10 = arith.constant 0 : index
    %c1 = arith.constant 1 : index
    %c0_11 = arith.constant 0 : index
    %c0_12 = arith.constant 0 : index
    %12 = vector.load %arg3[%c0_10, %c1, %c0_11, %c0_12] : memref<1x4x32x32xbf16, #tpu.memory_space<vmem>>, vector<1x1x32x32xbf16>
    %13 = vector.shape_cast %12 : vector<1x1x32x32xbf16> to vector<32x32xbf16>
    %cst_13 = arith.constant dense<0.000000e+00> : vector<16x32xf32>
    %14 = tpu.matmul %4, %13, %cst_13 {dimension_numbers = #tpu.dot_dimension_numbers<[1], [0], [0], [1], [0, 0, 1, 1], [], []>} : vector<16x32xbf16>, vector<32x32xbf16>, vector<16x32xf32> -> vector<16x32xf32>
    %c0_14 = arith.constant 0 : index
    %c1_15 = arith.constant 1 : index
    %c0_16 = arith.constant 0 : index
    %c0_17 = arith.constant 0 : index
    %15 = vector.load %arg6[%c0_14, %c1_15, %c0_16, %c0_17] : memref<1x9x1x32xf32, #tpu.memory_space<vmem>>, vector<1x1x1x32xf32>
    %16 = vector.shape_cast %15 : vector<1x1x1x32xf32> to vector<1x32xf32>
    %17 = vector.broadcast %16 : vector<1x32xf32> to vector<16x32xf32>
    %18 = arith.addf %14, %17 : vector<16x32xf32>
    %c0_18 = arith.constant 0 : index
    %c2 = arith.constant 2 : index
    %c0_19 = arith.constant 0 : index
    %c0_20 = arith.constant 0 : index
    %19 = vector.load %arg3[%c0_18, %c2, %c0_19, %c0_20] : memref<1x4x32x32xbf16, #tpu.memory_space<vmem>>, vector<1x1x32x32xbf16>
    %20 = vector.shape_cast %19 : vector<1x1x32x32xbf16> to vector<32x32xbf16>
    %cst_21 = arith.constant dense<0.000000e+00> : vector<16x32xf32>
    %21 = tpu.matmul %4, %20, %cst_21 {dimension_numbers = #tpu.dot_dimension_numbers<[1], [0], [0], [1], [0, 0, 1, 1], [], []>} : vector<16x32xbf16>, vector<32x32xbf16>, vector<16x32xf32> -> vector<16x32xf32>
    %c0_22 = arith.constant 0 : index
    %c2_23 = arith.constant 2 : index
    %c0_24 = arith.constant 0 : index
    %c0_25 = arith.constant 0 : index
    %22 = vector.load %arg6[%c0_22, %c2_23, %c0_24, %c0_25] : memref<1x9x1x32xf32, #tpu.memory_space<vmem>>, vector<1x1x1x32xf32>
    %23 = vector.shape_cast %22 : vector<1x1x1x32xf32> to vector<1x32xf32>
    %24 = vector.broadcast %23 : vector<1x32xf32> to vector<16x32xf32>
    %25 = arith.addf %21, %24 : vector<16x32xf32>
    %26 = arith.truncf %11 : vector<16x32xf32> to vector<16x32xbf16>
    %27 = arith.truncf %18 : vector<16x32xf32> to vector<16x32xbf16>
    "tpu.trace_start"() <{level = 10 : i32, message = "qh,kh->qk"}> : () -> ()
    %cst_26 = arith.constant dense<0.000000e+00> : vector<16x16xf32>
    %28 = tpu.matmul %26, %27, %cst_26 {dimension_numbers = #tpu.dot_dimension_numbers<[1], [1], [0], [0], [0, 0, 1, 0], [], []>} : vector<16x32xbf16>, vector<16x32xbf16>, vector<16x16xf32> -> vector<16x16xf32>
    "tpu.trace_stop"() : () -> ()
    %cst_27 = arith.constant 0.176776692 : f32
    %29 = vector.broadcast %cst_27 : f32 to vector<16x16xf32>
    %30 = arith.mulf %28, %29 : vector<16x16xf32>
    %c0_28 = arith.constant 0 : index
    %c0_29 = arith.constant 0 : index
    %31 = vector.load %arg2[%c0_28, %c0_29] : memref<16x16xf32, #tpu.memory_space<vmem>>, vector<16x16xf32>
    %32 = arith.addf %30, %31 : vector<16x16xf32>
    %cst_30 = arith.constant dense<0xFF800000> : vector<16xf32>
    %33 = vector.multi_reduction <maximumf>, %32, %cst_30 [1] : vector<16x16xf32> to vector<16xf32>
    %34 = vector.shape_cast %33 : vector<16xf32> to vector<16x1xf32>
    %35 = vector.broadcast %34 : vector<16x1xf32> to vector<16x16xf32>
    %36 = arith.subf %32, %35 : vector<16x16xf32>
    %37 = math.exp %36 : vector<16x16xf32>
    %cst_31 = arith.constant dense<0.000000e+00> : vector<16xf32>
    %38 = vector.multi_reduction <add>, %37, %cst_31 [1] : vector<16x16xf32> to vector<16xf32>
    %39 = vector.shape_cast %38 : vector<16xf32> to vector<16x1xf32>
    %40 = tpu.reciprocal %39 {approx = true} : vector<16x1xf32> -> vector<16x1xf32>
    %41 = vector.broadcast %40 : vector<16x1xf32> to vector<16x16xf32>
    %42 = arith.mulf %37, %41 : vector<16x16xf32>
    %43 = arith.truncf %42 : vector<16x16xf32> to vector<16x16xbf16>
    %44 = arith.truncf %25 : vector<16x32xf32> to vector<16x32xbf16>
    %cst_32 = arith.constant dense<0.000000e+00> : vector<16x32xf32>
    %45 = tpu.matmul %43, %44, %cst_32 {dimension_numbers = #tpu.dot_dimension_numbers<[1], [0], [0], [1], [0, 0, 1, 1], [], []>} : vector<16x16xbf16>, vector<16x32xbf16>, vector<16x32xf32> -> vector<16x32xf32>
    %46 = arith.truncf %45 : vector<16x32xf32> to vector<16x32xbf16>
    %c0_33 = arith.constant 0 : index
    %c3 = arith.constant 3 : index
    %c0_34 = arith.constant 0 : index
    %c0_35 = arith.constant 0 : index
    %47 = vector.load %arg3[%c0_33, %c3, %c0_34, %c0_35] : memref<1x4x32x32xbf16, #tpu.memory_space<vmem>>, vector<1x1x32x32xbf16>
    %48 = vector.shape_cast %47 : vector<1x1x32x32xbf16> to vector<32x32xbf16>
    %cst_36 = arith.constant dense<0.000000e+00> : vector<16x32xf32>
    %49 = tpu.matmul %46, %48, %cst_36 {dimension_numbers = #tpu.dot_dimension_numbers<[1], [0], [0], [1], [0, 0, 1, 1], [], []>} : vector<16x32xbf16>, vector<32x32xbf16>, vector<16x32xf32> -> vector<16x32xf32>
    %c0_37 = arith.constant 0 : index
    %c3_38 = arith.constant 3 : index
    %c0_39 = arith.constant 0 : index
    %c0_40 = arith.constant 0 : index
    %50 = vector.load %arg6[%c0_37, %c3_38, %c0_39, %c0_40] : memref<1x9x1x32xf32, #tpu.memory_space<vmem>>, vector<1x1x1x32xf32>
    %51 = vector.shape_cast %50 : vector<1x1x1x32xf32> to vector<1x32xf32>
    %52 = vector.broadcast %51 : vector<1x32xf32> to vector<16x32xf32>
    %53 = arith.addf %49, %52 : vector<16x32xf32>
    %54 = arith.addf %3, %53 : vector<16x32xf32>
    %c0_41 = arith.constant 0 : index
    %c4 = arith.constant 4 : index
    %c0_42 = arith.constant 0 : index
    %c0_43 = arith.constant 0 : index
    %55 = vector.load %arg6[%c0_41, %c4, %c0_42, %c0_43] : memref<1x9x1x32xf32, #tpu.memory_space<vmem>>, vector<1x1x1x32xf32>
    %56 = vector.shape_cast %55 : vector<1x1x1x32xf32> to vector<1x32xf32>
    %c0_44 = arith.constant 0 : index
    %c5 = arith.constant 5 : index
    %c0_45 = arith.constant 0 : index
    %c0_46 = arith.constant 0 : index
    %57 = vector.load %arg6[%c0_44, %c5, %c0_45, %c0_46] : memref<1x9x1x32xf32, #tpu.memory_space<vmem>>, vector<1x1x1x32xf32>
    %58 = vector.shape_cast %57 : vector<1x1x1x32xf32> to vector<1x32xf32>
    %cst_47 = arith.constant dense<0.000000e+00> : vector<16xf32>
    %59 = vector.multi_reduction <add>, %54, %cst_47 [1] : vector<16x32xf32> to vector<16xf32>
    %60 = vector.shape_cast %59 : vector<16xf32> to vector<16x1xf32>
    %cst_48 = arith.constant 3.200000e+01 : f32
    %61 = vector.broadcast %cst_48 : f32 to vector<16x1xf32>
    %62 = arith.divf %60, %61 : vector<16x1xf32>
    %63 = vector.broadcast %62 : vector<16x1xf32> to vector<16x32xf32>
    %64 = arith.subf %54, %63 : vector<16x32xf32>
    %65 = arith.mulf %64, %64 : vector<16x32xf32>
    %cst_49 = arith.constant dense<0.000000e+00> : vector<16xf32>
    %66 = vector.multi_reduction <add>, %65, %cst_49 [1] : vector<16x32xf32> to vector<16xf32>
    %67 = vector.shape_cast %66 : vector<16xf32> to vector<16x1xf32>
    %cst_50 = arith.constant 3.200000e+01 : f32
    %68 = vector.broadcast %cst_50 : f32 to vector<16x1xf32>
    %69 = arith.divf %67, %68 : vector<16x1xf32>
    %70 = vector.broadcast %62 : vector<16x1xf32> to vector<16x32xf32>
    %71 = arith.subf %54, %70 : vector<16x32xf32>
    %cst_51 = arith.constant 9.99999996E-13 : f32
    %72 = vector.broadcast %cst_51 : f32 to vector<16x1xf32>
    %73 = arith.addf %69, %72 : vector<16x1xf32>
    %74 = math.rsqrt %73 : vector<16x1xf32>
    %75 = vector.broadcast %74 : vector<16x1xf32> to vector<16x32xf32>
    %76 = arith.mulf %71, %75 : vector<16x32xf32>
    %77 = vector.broadcast %56 : vector<1x32xf32> to vector<16x32xf32>
    %78 = arith.mulf %76, %77 : vector<16x32xf32>
    %79 = vector.broadcast %58 : vector<1x32xf32> to vector<16x32xf32>
    %80 = arith.addf %78, %79 : vector<16x32xf32>
    %81 = arith.truncf %80 : vector<16x32xf32> to vector<16x32xbf16>
    %c0_52 = arith.constant 0 : index
    %c0_53 = arith.constant 0 : index
    %c0_54 = arith.constant 0 : index
    %82 = vector.load %arg4[%c0_52, %c0_53, %c0_54] : memref<1x32x64xbf16, #tpu.memory_space<vmem>>, vector<1x32x64xbf16>
    %83 = vector.shape_cast %82 : vector<1x32x64xbf16> to vector<32x64xbf16>
    %cst_55 = arith.constant dense<0.000000e+00> : vector<16x64xf32>
    %84 = tpu.matmul %81, %83, %cst_55 {dimension_numbers = #tpu.dot_dimension_numbers<[1], [0], [0], [1], [0, 0, 1, 1], [], []>} : vector<16x32xbf16>, vector<32x64xbf16>, vector<16x64xf32> -> vector<16x64xf32>
    %c0_56 = arith.constant 0 : index
    %c0_57 = arith.constant 0 : index
    %c0_58 = arith.constant 0 : index
    %85 = vector.load %arg7[%c0_56, %c0_57, %c0_58] : memref<1x1x64xf32, #tpu.memory_space<vmem>>, vector<1x1x64xf32>
    %86 = vector.shape_cast %85 : vector<1x1x64xf32> to vector<1x64xf32>
    %87 = vector.broadcast %86 : vector<1x64xf32> to vector<16x64xf32>
    %88 = arith.addf %84, %87 : vector<16x64xf32>
    %cst_59 = arith.constant 5.000000e-01 : f32
    %89 = vector.broadcast %cst_59 : f32 to vector<16x64xf32>
    %90 = arith.mulf %89, %88 : vector<16x64xf32>
    %cst_60 = arith.constant 4.471500e-02 : f32
    %91 = vector.broadcast %cst_60 : f32 to vector<16x64xf32>
    %92 = arith.mulf %91, %88 : vector<16x64xf32>
    %93 = arith.mulf %92, %88 : vector<16x64xf32>
    %94 = arith.mulf %93, %88 : vector<16x64xf32>
    %95 = arith.addf %88, %94 : vector<16x64xf32>
    %cst_61 = arith.constant 0.797884583 : f32
    %96 = vector.broadcast %cst_61 : f32 to vector<16x64xf32>
    %97 = arith.mulf %96, %95 : vector<16x64xf32>
    %98 = math.tanh %97 : vector<16x64xf32>
    %cst_62 = arith.constant 1.000000e+00 : f32
    %99 = vector.broadcast %cst_62 : f32 to vector<16x64xf32>
    %100 = arith.addf %99, %98 : vector<16x64xf32>
    %101 = arith.mulf %90, %100 : vector<16x64xf32>
    %102 = arith.truncf %101 : vector<16x64xf32> to vector<16x64xbf16>
    %c0_63 = arith.constant 0 : index
    %c0_64 = arith.constant 0 : index
    %c0_65 = arith.constant 0 : index
    %103 = vector.load %arg5[%c0_63, %c0_64, %c0_65] : memref<1x64x32xbf16, #tpu.memory_space<vmem>>, vector<1x64x32xbf16>
    %104 = vector.shape_cast %103 : vector<1x64x32xbf16> to vector<64x32xbf16>
    %cst_66 = arith.constant dense<0.000000e+00> : vector<16x32xf32>
    %105 = tpu.matmul %102, %104, %cst_66 {dimension_numbers = #tpu.dot_dimension_numbers<[1], [0], [0], [1], [0, 0, 1, 1], [], []>} : vector<16x64xbf16>, vector<64x32xbf16>, vector<16x32xf32> -> vector<16x32xf32>
    %c0_67 = arith.constant 0 : index
    %c6 = arith.constant 6 : index
    %c0_68 = arith.constant 0 : index
    %c0_69 = arith.constant 0 : index
    %106 = vector.load %arg6[%c0_67, %c6, %c0_68, %c0_69] : memref<1x9x1x32xf32, #tpu.memory_space<vmem>>, vector<1x1x1x32xf32>
    %107 = vector.shape_cast %106 : vector<1x1x1x32xf32> to vector<1x32xf32>
    %108 = vector.broadcast %107 : vector<1x32xf32> to vector<16x32xf32>
    %109 = arith.addf %105, %108 : vector<16x32xf32>
    %110 = arith.addf %80, %109 : vector<16x32xf32>
    %c0_70 = arith.constant 0 : index
    %c7 = arith.constant 7 : index
    %c0_71 = arith.constant 0 : index
    %c0_72 = arith.constant 0 : index
    %111 = vector.load %arg6[%c0_70, %c7, %c0_71, %c0_72] : memref<1x9x1x32xf32, #tpu.memory_space<vmem>>, vector<1x1x1x32xf32>
    %112 = vector.shape_cast %111 : vector<1x1x1x32xf32> to vector<1x32xf32>
    %c0_73 = arith.constant 0 : index
    %c8 = arith.constant 8 : index
    %c0_74 = arith.constant 0 : index
    %c0_75 = arith.constant 0 : index
    %113 = vector.load %arg6[%c0_73, %c8, %c0_74, %c0_75] : memref<1x9x1x32xf32, #tpu.memory_space<vmem>>, vector<1x1x1x32xf32>
    %114 = vector.shape_cast %113 : vector<1x1x1x32xf32> to vector<1x32xf32>
    %cst_76 = arith.constant dense<0.000000e+00> : vector<16xf32>
    %115 = vector.multi_reduction <add>, %110, %cst_76 [1] : vector<16x32xf32> to vector<16xf32>
    %116 = vector.shape_cast %115 : vector<16xf32> to vector<16x1xf32>
    %cst_77 = arith.constant 3.200000e+01 : f32
    %117 = vector.broadcast %cst_77 : f32 to vector<16x1xf32>
    %118 = arith.divf %116, %117 : vector<16x1xf32>
    %119 = vector.broadcast %118 : vector<16x1xf32> to vector<16x32xf32>
    %120 = arith.subf %110, %119 : vector<16x32xf32>
    %121 = arith.mulf %120, %120 : vector<16x32xf32>
    %cst_78 = arith.constant dense<0.000000e+00> : vector<16xf32>
    %122 = vector.multi_reduction <add>, %121, %cst_78 [1] : vector<16x32xf32> to vector<16xf32>
    %123 = vector.shape_cast %122 : vector<16xf32> to vector<16x1xf32>
    %cst_79 = arith.constant 3.200000e+01 : f32
    %124 = vector.broadcast %cst_79 : f32 to vector<16x1xf32>
    %125 = arith.divf %123, %124 : vector<16x1xf32>
    %126 = vector.broadcast %118 : vector<16x1xf32> to vector<16x32xf32>
    %127 = arith.subf %110, %126 : vector<16x32xf32>
    %cst_80 = arith.constant 9.99999996E-13 : f32
    %128 = vector.broadcast %cst_80 : f32 to vector<16x1xf32>
    %129 = arith.addf %125, %128 : vector<16x1xf32>
    %130 = math.rsqrt %129 : vector<16x1xf32>
    %131 = vector.broadcast %130 : vector<16x1xf32> to vector<16x32xf32>
    %132 = arith.mulf %127, %131 : vector<16x32xf32>
    %133 = vector.broadcast %112 : vector<1x32xf32> to vector<16x32xf32>
    %134 = arith.mulf %132, %133 : vector<16x32xf32>
    %135 = vector.broadcast %114 : vector<1x32xf32> to vector<16x32xf32>
    %136 = arith.addf %134, %135 : vector<16x32xf32>
    %c0_81 = arith.constant 0 : index
    %c0_82 = arith.constant 0 : index
    %137 = vector.load %arg9[%c0_81, %c0_82] : memref<16x32xf32, #tpu.memory_space<vmem>>, vector<16x32xf32>
    tpu.vector_store %arg9[%c0_81, %c0_82], %136 {strides = array<i32>} : memref<16x32xf32, #tpu.memory_space<vmem>>, vector<16x32xf32>,
    %c0_i32_83 = arith.constant 0 : i32
    %138 = arith.cmpi sge, %arg0, %c0_i32_83 : i32
    %139 = arith.extui %138 : i1 to i32
    %c0_i32_84 = arith.constant 0 : i32
    %140 = arith.cmpi ne, %139, %c0_i32_84 : i32
    scf.if %140 {
      %c0_85 = arith.constant 0 : index
      %c0_86 = arith.constant 0 : index
      %141 = vector.load %arg8[%c0_85, %c0_86] : memref<16x32xf32, #tpu.memory_space<vmem>>, vector<16x32xf32>
      %142 = arith.addf %141, %136 : vector<16x32xf32>
      %c0_87 = arith.constant 0 : index
      %c0_88 = arith.constant 0 : index
      %143 = vector.load %arg8[%c0_87, %c0_88] : memref<16x32xf32, #tpu.memory_space<vmem>>, vector<16x32xf32>
      tpu.vector_store %arg8[%c0_87, %c0_88], %142 {strides = array<i32>} : memref<16x32xf32, #tpu.memory_space<vmem>>, vector<16x32xf32>,
    } else {
    }
    return
  }
  func.func @transform_0(%arg0: i32) -> (i32, i32) {
    %c0_i32 = arith.constant 0 : i32
    %c0_i32_0 = arith.constant 0 : i32
    %c0_i32_1 = arith.constant 0 : i32
    return %c0_i32, %c0_i32_0 : i32, i32
  }
  func.func @transform_1(%arg0: i32) -> (i32, i32) {
    %c0_i32 = arith.constant 0 : i32
    %c0_i32_0 = arith.constant 0 : i32
    %c0_i32_1 = arith.constant 0 : i32
    return %c0_i32, %c0_i32_0 : i32, i32
  }
  func.func @transform_2(%arg0: i32) -> (i32, i32, i32, i32) {
    %c0_i32 = arith.constant 0 : i32
    %c0_i32_0 = arith.constant 0 : i32
    %c0_i32_1 = arith.constant 0 : i32
    %c0_i32_2 = arith.constant 0 : i32
    return %arg0, %c0_i32, %c0_i32_0, %c0_i32_1 : i32, i32, i32, i32
  }
  func.func @transform_3(%arg0: i32) -> (i32, i32, i32) {
    %c0_i32 = arith.constant 0 : i32
    %c0_i32_0 = arith.constant 0 : i32
    %c0_i32_1 = arith.constant 0 : i32
    return %arg0, %c0_i32, %c0_i32_0 : i32, i32, i32
  }
  func.func @transform_4(%arg0: i32) -> (i32, i32, i32) {
    %c0_i32 = arith.constant 0 : i32
    %c0_i32_0 = arith.constant 0 : i32
    %c0_i32_1 = arith.constant 0 : i32
    return %arg0, %c0_i32, %c0_i32_0 : i32, i32, i32
  }
  func.func @transform_5(%arg0: i32) -> (i32, i32, i32, i32) {
    %c0_i32 = arith.constant 0 : i32
    %c0_i32_0 = arith.constant 0 : i32
    %c0_i32_1 = arith.constant 0 : i32
    %c0_i32_2 = arith.constant 0 : i32
    return %arg0, %c0_i32, %c0_i32_0, %c0_i32_1 : i32, i32, i32, i32
  }
  func.func @transform_6(%arg0: i32) -> (i32, i32, i32) {
    %c0_i32 = arith.constant 0 : i32
    %c0_i32_0 = arith.constant 0 : i32
    %c0_i32_1 = arith.constant 0 : i32
    return %arg0, %c0_i32, %c0_i32_0 : i32, i32, i32
  }
  func.func @transform_7(%arg0: i32) -> (i32, i32) {
    %c0_i32 = arith.constant 0 : i32
    %c0_i32_0 = arith.constant 0 : i32
    %c0_i32_1 = arith.constant 0 : i32
    return %c0_i32, %c0_i32_0 : i32, i32
  }
}

</mosaic_0001>

<bundles_post_ra>
// kernel: pretrained_encoder_forward.1
= control target key start
LH: loop header
LB: loop body
LE: loop exit
PB: predicated region body
PF: predicated region fallthrough
CT: control target
= control target key end

     0   :  { %12 = vsyncpa [#allocation4], 0  ;;  %s1415_s24 = smov 0   ;;  %s1578_s0 = inlined_call_operand.vmem [shape: f32[16,32], index: 0, kind: input, shape index: {}]   ;;  %s1579_s1 = inlined_call_operand.vmem [shape: f32[16,16], index: 1, kind: input, shape index: {}]   ;;  %s1580_s2 = inlined_call_operand.vmem [shape: bf16[4,4,32,32], index: 2, kind: input, shape index: {}]   ;;  %s1581_s3 = inlined_call_operand.vmem [shape: bf16[4,32,64], index: 3, kind: input, shape index: {}]   ;;  %s1582_s4 = inlined_call_operand.vmem [shape: bf16[4,64,32], index: 4, kind: input, shape index: {}]   ;;  %s1583_s5 = inlined_call_operand.vmem [shape: f32[4,9,1,32], index: 5, kind: input, shape index: {}]   ;;  %s1584_s6 = inlined_call_operand.vmem [shape: f32[4,1,64], index: 6, kind: input, shape index: {}]   ;;  %s1585_s7 = inlined_call_operand.hbm [shape: f32[16,32], index: 7, kind: output, shape index: {}]  }
   0x1 LB: > { %s1421_s25 = sadd.s32 4294967295, %s1367_s24   ;;  %p1122_p0 = scmp.ge.s32.totalorder %s1367_s24, 1  ;;  %s1367_s24 = sphi %s1415_s24, %s18_s24  }
   0x2   : > { %p270_p1 = scmp.lt.s32.totalorder %s1367_s24, 5 }
   0x4   : > { %p271_p2 = pnand %p1122_p0, %p270_p1 }
   0x5   : > { %p314_p3 = scmp.lt.s32.totalorder (!%p271_p2), %s1421_s25, 3  ;;  %p1129_p4 = scmp.ne.s32.totalorder (!%p271_p2), %s1421_s25, 0 }
   0x6   : > { %274 = sbr.rel (%p271_p2) target bundleno = 2227 (0x8b3), region = 48 }
   0xb   : > { %s1427_s26 = scalar_select %p314_p3, %s1421_s25, 3 }
   0xd   : > { %s1187_s27 = sshll.u32 %s1427_s26, 6  ;;  %s1188_s28 = sshll.u32 %s1427_s26, 4 }
   0xe   : > { %s1434_s8 = scalar_lea.vmem %s1580_s2, %s1187_s27  ;;  %s1439_s11 = scalar_lea.vmem %s1581_s3, %s1188_s28 }
   0xf   : > { %s1189_s12 = sshll.u32 %s1427_s26, 5  ;;  %s1278_s13 = smul.u32 9, %s1427_s26 }
  0x10   : > { %s1446_s16 = scalar_lea.vmem %s1582_s4, %s1189_s12  ;;  %s335_s19 = scalar_lea.vmem %s1584_s6, %s1427_s26 }
  0x11   : > { %s1455_s22 = scalar_lea.vmem %s1583_s5, %s1278_s13  ;;  %340 = sbr.rel (%p1129_p4) target bundleno = 25 (0x19), region = 52 }
  0x16   : > { %v341_v0 = vld [vmem:[%s1578_s0] sm:$0xff]  ;;  %vm343_vm0 = vcmask 261120   ;;  %v342_v1 = vld [vmem:[%s1578_s0 + $0x8] sm:$0xff]  ;;  %v1369_v2 = vmov 0.0  }
  0x17   : > { %344 = vst.msk [vmem:[#allocation2] sm:$0xff] %vm343_vm0, %v341_v0  ;;  %345 = vst.msk [vmem:[#allocation2 + $0x8] sm:$0xff] %vm343_vm0, %v342_v1 }
  0x18   : > { %346 = vst.msk [vmem:[#allocation3] sm:$0xff] %vm343_vm0, %v1369_v2  ;;  %347 = vst.msk [vmem:[#allocation3 + $0x8] sm:$0xff] %vm343_vm0, %v1369_v2 }
  0x19 PF: > { %v1299_v3 = vld [vmem:[%s1434_s8 + $0x18] sm:$0xff]   ;;  %v1370_v4 = vmov 0.0   ;;  %v1300_v5 = vld [vmem:[%s1434_s8 + $0x8] sm:$0xff]   ;;  %v1301_v6 = vld [vmem:[%s1434_s8 + $0x10] sm:$0xff]   ;;  %vm1371_vm1 = vmmov 0   ;;  %vm374_vm2 = vcmask 261120  }
  0x1a   : > { %1222 = vmatprep.subr.bf16.mxu1 %v1370_v4  ;;  %1214 = vmatprep.subr.bf16.mxu0 %v1370_v4  ;;  %v1302_v7 = vld [vmem:[%s1434_s8] sm:$0xff]   ;;  %v1303_v28 = vld [vmem:[%s1434_s8 + $0x28] sm:$0xff]   ;;  %vm606_vm3 = vcmask 130048   ;;  %vm921_vm4 = vcmask 523264   ;;  %p1182_p5 = scmp.lt.s32.totalorder %s1421_s25, 0 }
  0x1b   : > { %1223 = vmatpush3.bf16.msra.mxu1 %v1299_v3  ;;  %1226 = vmatprep.mubr.msk.bf16.mxu1 %vm1371_vm1, %v1370_v4  ;;  %v1139_v13 = vld [vmem:[%s1455_s22 + $0x1] ss:$0 sm:$0xff]  ;;  %v1130_v23 = vld [vmem:[%s1455_s22] ss:$0 sm:$0xff]  ;;  %v603_v36 = vld [vmem:[%s1579_s1 + $0x8] sm:$0xff] }
  0x1c   : > { %1215 = vmatpush3.bf16.msra.mxu0 %v1300_v5  ;;  %1224 = vmatprep.subr.bf16.mxu1 %v1370_v4  ;;  %v1304_v29 = vld [vmem:[%s1434_s8 + $0x20] sm:$0xff]   ;;  %v1305_v3 = vld [vmem:[%s1434_s8 + $0x38] sm:$0xff]   ;;  %v1306_v5 = vld [vmem:[%s1434_s8 + $0x30] sm:$0xff]  }
  0x1d   : > { %1216 = vmatprep.subr.bf16.mxu0 %v1370_v4  ;;  %1218 = vmatprep.mubr.msk.bf16.mxu0 %vm1371_vm1, %v1370_v4  ;;  %v602_v31 = vld [vmem:[%s1579_s1] sm:$0xff] }
  0x1e   : > { %v1474_v8 = vld [vmem:[#allocation2] sm:$0xff]  ;;  %v1476_v9 = vld [vmem:[#allocation2 + $0x8] sm:$0xff] }
  0x1f   : > { %v350_v10 = vpack.c.bf16 %v1476_v9, %v1474_v8  ;;  %1225 = vmatpush3.bf16.msra.mxu1 %v1301_v6  ;;  %v1148_v52 = vld [vmem:[%s1455_s22 + $0x2] ss:$0 sm:$0xff] }
  0x20   : > { %1217 = vmatpush3.bf16.msra.mxu0 %v1302_v7  ;;  %1238 = vmatprep.subr.bf16.mxu1 %v1370_v4 }
  0x21   : > { %1230 = vmatprep.subr.bf16.mxu0 %v1370_v4 }
  0x22   : > { %1227 = vmatmul.mubr.msk.bf16.vlgmr.msra.gmra.mxu1 %vm374_vm2, %v350_v10 }
  0x23   : > { %1219 = vmatmul.mubr.msk.bf16.vlgmr.msra.gmra.mxu0 %vm374_vm2, %v350_v10  ;;  %1240 = vmatprep.mubr.msk.bf16.mxu1 %vm1371_vm1, %v1370_v4 }
  0x24   : > { %1234 = vmatprep.mubr.msk.bf16.mxu0 %vm1371_vm1, %v1370_v4  ;;  %1231 = vmatpush3.bf16.msra.mxu0 %v1303_v28 }
  0x25   : > { %1232 = vmatprep.subr.bf16.mxu0 %v1370_v4 }
  0x28   : > { %1233 = vmatpush3.bf16.msra.mxu0 %v1304_v29 }
  0x29   : > { %1244 = vmatprep.subr.bf16.mxu0 %v1370_v4 }
  0x2b   : > { %1235 = vmatmul.mubr.msk.bf16.vlgmr.msra.gmra.mxu0 %vm374_vm2, %v350_v10 }
  0x2c   : > { %1246 = vmatprep.mubr.msk.bf16.mxu0 %vm1371_vm1, %v1370_v4 }
  0xe2   : > { %v478_v11 = vpop.f32.mrf.mxu1 }
  0xe3   : > { %v412_v12 = vpop.f32.mrf.mxu0  ;;  %v479_v17 = vadd.f32 %v1139_v13, %v478_v11 }
  0xe4   : > { %v1228_v14 = vpop.f32.mrf.mxu1  ;;  %v413_v25 = vadd.f32 %v1130_v23, %v412_v12 }
  0xe5   : > { %v1220_v15 = vpop.f32.mrf.mxu0 }
  0xe6   : > { %v481_v16 = vpop.f32.mrf.mxu1 }
  0xe7   : > { %v482_v18 = vadd.f32 %v1139_v13, %v481_v16  ;;  %v415_v19 = vpop.f32.mrf.mxu0  ;;  %v1159_v13 = vld [vmem:[%s1455_s22 + $0x3] ss:$0 sm:$0xff] }
  0xe8   : > { %v1229_v20 = vpop.f32.mrf.mxu1  ;;  %v416_v26 = vadd.f32 %v1130_v23, %v415_v19 }
  0xe9   : > { %v552_v21 = vpack.c.bf16 %v482_v18, %v479_v17  ;;  %v1221_v22 = vpop.f32.mrf.mxu0 }
  0xea   : > { %v551_v27 = vpack.c.bf16 %v416_v26, %v413_v25 }
  0xeb   : > { %v557_v24 = vsel %vm374_vm2, %v552_v21, 0  ;;  %v544_v53 = vpop.f32.mrf.mxu0 }
  0xec   : > { %1239 = vmatpush3.bf16.xpose.msra.mxu1 %v557_v24  ;;  %v545_v55 = vadd.f32 %v1148_v52, %v544_v53  ;;  %v1311_v53 = vld [vmem:[%s1446_s16 + $0x8] sm:$0xff]  }
  0xed   : > { %1250 = vmatprep.subr.bf16.mxu1 %v1370_v4  ;;  %v1236_v54 = vpop.f32.mrf.mxu0 }
  0xee   : > { %v1312_v54 = vld [vmem:[%s1446_s16] sm:$0xff]  }
  0xef   : > { %v547_v56 = vpop.f32.mrf.mxu0 }
  0xf0   : > { %v548_v57 = vadd.f32 %v1148_v52, %v547_v56  ;;  %v1310_v52 = vld [vmem:[%s1446_s16 + $0x10] sm:$0xff]  }
  0xf1   : > { %v1237_v58 = vpop.f32.mrf.mxu0 }
  0xf2   : > { %v630_v59 = vpack.c.bf16 %v548_v57, %v545_v55  ;;  %v1167_v55 = vld [vmem:[%s335_s19] ss:$0 sm:$0xff] }
  0xf3   : > { %1241 = vmatmul.mubr.msk.bf16.vlgmr.msra.gmra.mxu1 %vm374_vm2, %v551_v27 }
  0xf4   : > { %1254 = vmatprep.mubr.msk.bf16.mxu1 %vm1371_vm1, %v1370_v4  ;;  %1245 = vmatpush3.bf16.msra.mxu0 %v630_v59 }
  0xf5   : > { %1258 = vmatprep.subr.bf16.mxu0 %v1370_v4  ;;  %1251 = vmatpush3.bf16.msra.mxu1 %v1305_v3 }
  0xf6   : > { %1252 = vmatprep.subr.bf16.mxu1 %v1370_v4 }
  0xf9   : > { %1253 = vmatpush3.bf16.msra.mxu1 %v1306_v5 }
  0xfa   : > { %1266 = vmatprep.subr.bf16.mxu1 %v1370_v4 }
 0x1b3   : > { %v593_v30 = vpop.f32.mrf.mxu1 }
 0x1b4   : > { %v600_v32 = vmul.f32 0.17677669, %v593_v30 }
 0x1b5   : > { %v1242_v33 = vpop.f32.mrf.mxu1 }
 0x1b6   : > { %v604_v34 = vadd.f32 %v602_v31, %v600_v32  ;;  %v1308_v33 = vld [vmem:[%s1439_s11] sm:$0xff]  }
 0x1b7   : > { %v596_v35 = vpop.f32.mrf.mxu1 }
 0x1b8   : > { %v601_v37 = vmul.f32 0.17677669, %v596_v35  ;;  %v607_v38 = vsel %vm606_vm3, %v604_v34, -inf }
 0x1b9   : > { %608 = vmax.xlane.f32.xlu0 %v607_v38  ;;  %v1243_v39 = vpop.f32.mrf.mxu1 }
 0x1ba   : > { %v605_v40 = vadd.f32 %v603_v36, %v601_v37 }
 0x1bc   : > { %v610_v41 = vsel %vm606_vm3, %v605_v40, -inf }
 0x1bd   : > { %611 = vmax.xlane.f32.xlu0 %v610_v41 }
 0x242   : > { %v609_v42 = vpop.xlane.xlu0 %608 }
 0x243   : > { %v613_v43 = vsub.f32 %v604_v34, %v609_v42  ;;  %v1165_v42 = vld [vmem:[%s1455_s22 + $0x4] ss:$0 sm:$0xff] }
 0x245   : > { %v615_v44 = vmul.f32 1.442695, %v613_v43 }
 0x246   : > { %v612_v45 = vpop.xlane.xlu0 %611 }
 0x247   : > { %1313 = vpow2.f32 %v615_v44  ;;  %v614_v46 = vsub.f32 %v605_v40, %v612_v45 }
 0x249   : > { %v617_v47 = vmul.f32 1.442695, %v614_v46  ;;  %v1166_v46 = vld [vmem:[%s1455_s22 + $0x5] ss:$0 sm:$0xff] }
 0x24b   : > { %1315 = vpow2.f32 %v617_v47 }
 0x254   : > { %v1314_v48 = vpop.eup %1313 }
 0x255   : > { %v619_v49 = vsel %vm606_vm3, %v1314_v48, 0.0 }
 0x256   : > { %620 = vadd.xlane.f32.xlu1 %v619_v49 }
 0x258   : > { %v1316_v50 = vpop.eup %1315 }
 0x259   : > { %v622_v51 = vsel %vm606_vm3, %v1316_v50, 0.0 }
 0x25a   : > { %623 = vadd.xlane.f32.xlu1 %v622_v51  ;;  %v1309_v51 = vld [vmem:[%s1446_s16 + $0x18] sm:$0xff]  }
 0x2df   : > { %v621_v60 = vpop.xlane.xlu1 %620 }
 0x2e0   : > { %1317 = vrcp.f32 %v621_v60 }
 0x2e3   : > { %v624_v61 = vpop.xlane.xlu1 %623 }
 0x2e4   : > { %1319 = vrcp.f32 %v624_v61 }
 0x2ed   : > { %v1318_v62 = vpop.eup %1317 }
 0x2ee   : > { %v627_v0 = vmul.f32 %v1318_v62, %v1314_v48 }
 0x2f1   : > { %v1320_v63 = vpop.eup %1319 }
 0x2f2   : > { %v628_v1 = vmul.f32 %v1320_v63, %v1316_v50 }
 0x2f4   : > { %v629_v2 = vpack.c.bf16 %v628_v1, %v627_v0 }
 0x2f6   : > { %1247 = vmatmul.mubr.msk.bf16.vlgmr.msra.gmra.mxu0 %vm606_vm3, %v629_v2 }
 0x2f7   : > { %1262 = vmatprep.mubr.msk.bf16.mxu0 %vm1371_vm1, %v1370_v4 }
 0x3b6   : > { %v668_v6 = vpop.f32.mrf.mxu0 }
 0x3b8   : > { %v1248_v7 = vpop.f32.mrf.mxu0 }
 0x3ba   : > { %v671_v10 = vpop.f32.mrf.mxu0 }
 0x3bb   : > { %v675_v11 = vpack.c.bf16 %v671_v10, %v668_v6 }
 0x3bc   : > { %v1249_v12 = vpop.f32.mrf.mxu0 }
 0x3bd   : > { %1255 = vmatmul.mubr.msk.bf16.vlgmr.msra.gmra.mxu1 %vm374_vm2, %v675_v11 }
 0x3be   : > { %1274 = vmatprep.mubr.msk.bf16.mxu1 %vm1371_vm1, %v1370_v4  ;;  %1267 = vmatpush3.bf16.msra.mxu1 %v1309_v51 }
 0x3bf   : > { %1268 = vmatprep.subr.bf16.mxu1 %v1370_v4 }
 0x3c2   : > { %1269 = vmatpush3.bf16.msra.mxu1 %v1310_v52 }
 0x3c3   : > { %1270 = vmatprep.subr.bf16.mxu1 %v1370_v4 }
 0x3c6   : > { %1271 = vmatpush3.bf16.msra.mxu1 %v1311_v53 }
 0x3c7   : > { %1272 = vmatprep.subr.bf16.mxu1 %v1370_v4 }
 0x3ca   : > { %1273 = vmatpush3.bf16.msra.mxu1 %v1312_v54 }
 0x47d   : > { %v738_v14 = vpop.f32.mrf.mxu1 }
 0x47e   : > { %v739_v15 = vadd.f32 %v1159_v13, %v738_v14 }
 0x47f   : > { %v1256_v16 = vpop.f32.mrf.mxu1 }
 0x480   : > { %v745_v17 = vadd.f32 %v739_v15, %v1474_v8 }
 0x481   : > { %v741_v18 = vpop.f32.mrf.mxu1 }
 0x482   : > { %v742_v19 = vadd.f32 %v1159_v13, %v741_v18  ;;  %v751_v20 = vsel %vm374_vm2, %v745_v17, 0.0 }
 0x483   : > { %752 = vadd.xlane.f32.xlu0 %v751_v20  ;;  %v1257_v21 = vpop.f32.mrf.mxu1 }
 0x484   : > { %v746_v22 = vadd.f32 %v742_v19, %v1476_v9  ;;  %v1307_v9 = vld [vmem:[%s1439_s11 + $0x8] sm:$0xff]   ;;  %v1172_v19 = vld [vmem:[%s1455_s22 + $0x6] ss:$0 sm:$0xff] }
 0x485   : > { %1259 = vmatpush3.bf16.msra.mxu0 %v1307_v9 }
 0x486   : > { %v754_v23 = vsel %vm374_vm2, %v746_v22, 0.0  ;;  %1260 = vmatprep.subr.bf16.mxu0 %v1370_v4 }
 0x487   : > { %755 = vadd.xlane.f32.xlu1 %v754_v23 }
 0x489   : > { %1261 = vmatpush3.bf16.msra.mxu0 %v1308_v33 }
 0x50c   : > { %v753_v24 = vpop.xlane.xlu0 %752 }
 0x50d   : > { %v758_v25 = vmul.f32 0.03125, %v753_v24 }
 0x50f   : > { %v760_v26 = vsub.f32 %v745_v17, %v758_v25 }
 0x510   : > { %v756_v27 = vpop.xlane.xlu1 %755 }
 0x511   : > { %v759_v28 = vmul.f32 0.03125, %v756_v27  ;;  %v762_v29 = vmul.f32 %v760_v26, %v760_v26 }
 0x513   : > { %v761_v8 = vsub.f32 %v746_v22, %v759_v28  ;;  %v764_v30 = vsel %vm374_vm2, %v762_v29, 0.0 }
 0x514   : > { %765 = vadd.xlane.f32.xlu0 %v764_v30 }
 0x515   : > { %v763_v31 = vmul.f32 %v761_v8, %v761_v8 }
 0x517   : > { %v767_v32 = vsel %vm374_vm2, %v763_v31, 0.0 }
 0x518   : > { %768 = vadd.xlane.f32.xlu1 %v767_v32 }
 0x59d   : > { %v766_v34 = vpop.xlane.xlu0 %765 }
 0x59e   : > { %v770_v35 = vmul.f32 0.03125, %v766_v34 }
 0x5a0   : > { %v772_v36 = vadd.f32 1e-12, %v770_v35 }
 0x5a1   : > { %v769_v37 = vpop.xlane.xlu1 %768 }
 0x5a2   : > { %1321 = vrsqrt.f32 %v772_v36  ;;  %v771_v38 = vmul.f32 0.03125, %v769_v37 }
 0x5a4   : > { %v773_v39 = vadd.f32 1e-12, %v771_v38 }
 0x5a6   : > { %1323 = vrsqrt.f32 %v773_v39 }
 0x5af   : > { %v1322_v40 = vpop.eup %1321 }
 0x5b0   : > { %v776_v41 = vmul.f32 %v1322_v40, %v760_v26 }
 0x5b2   : > { %v784_v45 = vmul.f32 %v1165_v42, %v776_v41 }
 0x5b3   : > { %v1324_v43 = vpop.eup %1323 }
 0x5b4   : > { %v777_v44 = vmul.f32 %v1324_v43, %v761_v8  ;;  %v792_v48 = vadd.f32 %v1166_v46, %v784_v45  ;;  %v1180_v45 = vld [vmem:[%s1455_s22 + $0x7] ss:$0 sm:$0xff] }
 0x5b6   : > { %v785_v47 = vmul.f32 %v1165_v42, %v777_v44 }
 0x5b8   : > { %v793_v49 = vadd.f32 %v1166_v46, %v785_v47  ;;  %v1181_v47 = vld [vmem:[%s1455_s22 + $0x8] ss:$0 sm:$0xff] }
 0x5ba   : > { %v794_v50 = vpack.c.bf16 %v793_v49, %v792_v48 }
 0x5bc   : > { %1263 = vmatmul.mubr.msk.bf16.vlgmr.msra.gmra.mxu0 %vm374_vm2, %v794_v50 }
 0x67c   : > { %v855_v56 = vpop.f32.mrf.mxu0 }
 0x67d   : > { %v856_v57 = vadd.f32 %v1167_v55, %v855_v56 }
 0x67e   : > { %v1264_v58 = vpop.f32.mrf.mxu0 }
 0x67f   : > { %v864_v59 = vmul.f32 0.044715, %v856_v57  ;;  %v862_v13 = vmul.f32 0.5, %v856_v57 }
 0x680   : > { %v858_v60 = vpop.f32.mrf.mxu0 }
 0x681   : > { %v866_v61 = vmul.f32 %v864_v59, %v856_v57  ;;  %v859_v62 = vadd.f32 %v1167_v55, %v858_v60 }
 0x682   : > { %v1265_v63 = vpop.f32.mrf.mxu0 }
 0x683   : > { %v868_v0 = vmul.f32 %v866_v61, %v856_v57  ;;  %v865_v1 = vmul.f32 0.044715, %v859_v62  ;;  %v863_v14 = vmul.f32 0.5, %v859_v62 }
 0x685   : > { %v870_v2 = vadd.f32 %v868_v0, %v856_v57  ;;  %v867_v3 = vmul.f32 %v865_v1, %v859_v62 }
 0x687   : > { %v872_v5 = vmul.f32 0.7978846, %v870_v2  ;;  %v869_v4 = vmul.f32 %v867_v3, %v859_v62 }
 0x689   : > { %1325 = vtanh.f32 %v872_v5  ;;  %v871_v6 = vadd.f32 %v869_v4, %v859_v62 }
 0x68b   : > { %v873_v7 = vmul.f32 0.7978846, %v871_v6 }
 0x68d   : > { %1327 = vtanh.f32 %v873_v7 }
 0x696   : > { %v1326_v10 = vpop.eup %1325 }
 0x697   : > { %v876_v11 = vadd.f32 1.0, %v1326_v10 }
 0x699   : > { %v878_v16 = vmul.f32 %v876_v11, %v862_v13 }
 0x69a   : > { %v1328_v12 = vpop.eup %1327 }
 0x69b   : > { %v877_v15 = vadd.f32 1.0, %v1328_v12 }
 0x69d   : > { %v879_v17 = vmul.f32 %v877_v15, %v863_v14 }
 0x69f   : > { %v880_v18 = vpack.c.bf16 %v879_v17, %v878_v16 }
 0x6a1   : > { %1275 = vmatmul.mubr.msk.bf16.vlgmr.msra.gmra.mxu1 %vm921_vm4, %v880_v18 }
 0x761   : > { %v959_v20 = vpop.f32.mrf.mxu1 }
 0x762   : > { %v960_v21 = vadd.f32 %v1172_v19, %v959_v20 }
 0x763   : > { %v1276_v22 = vpop.f32.mrf.mxu1 }
 0x764   : > { %v966_v23 = vadd.f32 %v960_v21, %v792_v48 }
 0x765   : > { %v962_v24 = vpop.f32.mrf.mxu1 }
 0x766   : > { %v963_v25 = vadd.f32 %v1172_v19, %v962_v24  ;;  %v972_v26 = vsel %vm374_vm2, %v966_v23, 0.0 }
 0x767   : > { %973 = vadd.xlane.f32.xlu0 %v972_v26  ;;  %v1277_v27 = vpop.f32.mrf.mxu1 }
 0x768   : > { %v967_v28 = vadd.f32 %v963_v25, %v793_v49 }
 0x76a   : > { %v975_v29 = vsel %vm374_vm2, %v967_v28, 0.0 }
 0x76b   : > { %976 = vadd.xlane.f32.xlu1 %v975_v29 }
 0x7f0   : > { %v974_v8 = vpop.xlane.xlu0 %973 }
 0x7f1   : > { %v978_v30 = vmul.f32 0.03125, %v974_v8 }
 0x7f3   : > { %v980_v31 = vsub.f32 %v966_v23, %v978_v30 }
 0x7f4   : > { %v977_v32 = vpop.xlane.xlu1 %976 }
 0x7f5   : > { %v979_v9 = vmul.f32 0.03125, %v977_v32  ;;  %v982_v33 = vmul.f32 %v980_v31, %v980_v31 }
 0x7f7   : > { %v981_v34 = vsub.f32 %v967_v28, %v979_v9  ;;  %v984_v35 = vsel %vm374_vm2, %v982_v33, 0.0 }
 0x7f8   : > { %985 = vadd.xlane.f32.xlu0 %v984_v35 }
 0x7f9   : > { %v983_v36 = vmul.f32 %v981_v34, %v981_v34 }
 0x7fb   : > { %v987_v37 = vsel %vm374_vm2, %v983_v36, 0.0 }
 0x7fc   : > { %988 = vadd.xlane.f32.xlu1 %v987_v37 }
 0x881   : > { %v986_v38 = vpop.xlane.xlu0 %985 }
 0x882   : > { %v990_v39 = vmul.f32 0.03125, %v986_v38 }
 0x884   : > { %v992_v40 = vadd.f32 1e-12, %v990_v39 }
 0x885   : > { %v989_v41 = vpop.xlane.xlu1 %988 }
 0x886   : > { %1329 = vrsqrt.f32 %v992_v40  ;;  %v991_v42 = vmul.f32 0.03125, %v989_v41 }
 0x888   : > { %v993_v43 = vadd.f32 1e-12, %v991_v42 }
 0x88a   : > { %1331 = vrsqrt.f32 %v993_v43 }
 0x893   : > { %v1330_v44 = vpop.eup %1329 }
 0x894   : > { %v996_v46 = vmul.f32 %v1330_v44, %v980_v31 }
 0x896   : > { %v1004_v48 = vmul.f32 %v1180_v45, %v996_v46 }
 0x897   : > { %v1332_v49 = vpop.eup %1331 }
 0x898   : > { %v1012_v50 = vadd.f32 %v1181_v47, %v1004_v48  ;;  %v997_v51 = vmul.f32 %v1332_v49, %v981_v34 }
 0x89a   : > { %1014 = vst.msk [vmem:[#allocation2] sm:$0xff] %vm374_vm2, %v1012_v50  ;;  %v1005_v52 = vmul.f32 %v1180_v45, %v997_v51  ;;  %1019 = sbr.rel (%p1182_p5) target bundleno = 2211 (0x8a3), region = 56 }
 0x89c   : > { %v1013_v53 = vadd.f32 %v1181_v47, %v1005_v52 }
 0x89e   : > { %1015 = vst.msk [vmem:[#allocation2 + $0x8] sm:$0xff] %vm374_vm2, %v1013_v53 }
 0x89f   : > { %v1020_v54 = vld [vmem:[#allocation3] sm:$0xff]  ;;  %v1021_v55 = vld [vmem:[#allocation3 + $0x8] sm:$0xff] }
 0x8a0   : > { %v1022_v56 = vadd.f32 %v1020_v54, %v1012_v50  ;;  %v1023_v57 = vadd.f32 %v1021_v55, %v1013_v53 }
 0x8a2   : > { %1024 = vst.msk [vmem:[#allocation3] sm:$0xff] %vm374_vm2, %v1022_v56  ;;  %1025 = vst.msk [vmem:[#allocation3 + $0x8] sm:$0xff] %vm374_vm2, %v1023_v57 }
 0x8a3 PF: > { %p1283_p6 = scmp.eq.s32.totalorder %s1421_s25, 3  ;;  %s1372_s26 = smov [#allocation3]  }
 0x8a4   : > { %s1032_s13 = sshll.u32 %s1372_s26, 4  ;;  %s1033_s13 = int_to_ptr.vmem [resolvable:$true] %s1032_s13 }
 0x8a5   : > { %s1333_s14 = scalar_lea.vmem %s1033_s13, 256  ;;  %p1340_p10 = scmp.lt.s32.totalorder %s1033_s13, %s1033_s13 }
 0x8a6   : > { %p1334_p7 = scmp.ne.s32.totalorder %s1033_s13, %s1333_s14  ;;  %p1341_p11 = scmp.lt.s32.totalorder %s1333_s14, %s1333_s14 }
 0x8a8   : > { %p1335_p8 = pnand %p1334_p7, %p1283_p6  ;;  %p1342_p12 = por %p1341_p11, %p1340_p10 }
 0x8aa   : > { %p1336_p9 = pneg %p1335_p8 }
 0x8ac   : > { %p1343_p13 = pnand %p1342_p12, %p1336_p9 }
 0x8ae   : > { %1346 = shalt.err (!%p1343_p13)
}
 0x8af   : > { %s1373_s15 = smov 128   ;;  %s1374_s16 = smov 8  }
 0x8b0   : > { %1280 = dma.vmem_to_hbm [thread:$0]  (%p1283_p6), %s1033_s13, 256, %s1585_s7, [#allocation4], %s1373_s15, %s1373_s15, %s1374_s16  }
 0x8b1   : > { %1362 = dma.done.wait (%p1283_p6), [#allocation4], 256  }
 0x8b2   : > { %1364 = vsyncadd (%p1283_p6), [#allocation4], 4294967040 }
 0x8b3 PF: > { %s18_s24 = sadd.s32 1, %s1367_s24  }
 0x8b4   : > { %p15_p0 = scmp.ge.s32.totalorder %s18_s24, 6  }
 0x8b6   :  { %17 = sbr.rel (!%p15_p0) target bundleno = 1 (0x1), region = 106 }
 0x8bb   :  { %1048 = vsyncpa [#allocation4], 1 }
 0x8bc   :  { %1050 = vsyncpa [#allocation4 + $0x1], 1 }

</bundles_post_ra>
